<compile_context>
chip_gen: v7x
topology: tpu7x:2x2x1
jax: 0.10.0
libtpu: 0.0.40
codegen_flags: <defaults>
</compile_context>

<pallas_src>
import math

import jax
import jax.numpy as jnp
from jax.experimental import pallas as pl
from jax.experimental.pallas import tpu as pltpu

_LANE = 128
_ROW_TILE_CAP = 4096    # 4096 rows * 128 lanes * 4 B = 2 MiB per f32 buffer
_ROW_TILE_MIN = 1024    # never shrink below 512 KiB just to add grid steps
_MIN_GRID_STEPS = 8     # target steps: shard across v7x's 2 TCs + pipeline


def _round_up(x, m):
    return ((x + m - 1) // m) * m


def _adjust_brightness_kernel(factor_ref, x_ref, o_ref):
    # factor_ref: (B,) f32 scalar-prefetched into SMEM
    # x_ref / o_ref: (1, tr, 128) VMEM tiles of one sample's flattened data
    f = factor_ref[pl.program_id(0)]
    x = x_ref[...].astype(jnp.float32)
    o_ref[...] = jnp.clip(x + f, 0.0, 1.0).astype(o_ref.dtype)


def _pick_row_tile(batch, rows):
    """Rows per tile: as big as bandwidth wants, with enough grid steps."""
    tr = min(rows, _ROW_TILE_CAP)
    if batch * pl.cdiv(rows, tr) < _MIN_GRID_STEPS:
        tiles_wanted = pl.cdiv(_MIN_GRID_STEPS, batch)
        tr_for_steps = _round_up(pl.cdiv(rows, tiles_wanted), 32)
        tr = min(tr, max(tr_for_steps, min(rows, _ROW_TILE_MIN)))
    return tr


def adjust_brightness_pallas(x, brightness_factor):
    """x: (B, *) array in [0, 1]; brightness_factor: float or array broadcastable to (B,)."""
    orig_shape = x.shape
    orig_dtype = x.dtype
    B = int(orig_shape[0])
    n_inner = int(math.prod(orig_shape[1:]))

    # Per-batch factor in f32 (compute happens in f32 in-kernel).
    factor = jnp.asarray(brightness_factor, dtype=jnp.float32).reshape(-1)
    factor = jnp.broadcast_to(factor, (B,))

    # Fast Pallas path needs each sample to flatten into whole 128-lane rows.
    # Otherwise use one fused XLA op: exactly one HBM read + one write, which
    # is cheaper than any pad/slice-based Pallas path for this HBM-bound op.
    # TODO(synk): ragged inner sizes (n_inner % 128 != 0) use the XLA fallback.
    if x.ndim < 2 or n_inner == 0 or n_inner % _LANE != 0:
        f = factor.reshape((B,) + (1,) * (x.ndim - 1))
        return jnp.clip(x.astype(jnp.float32) + f, 0.0, 1.0).astype(orig_dtype)

    rows = n_inner // _LANE
    tr = _pick_row_tile(B, rows)
    row_tiles = pl.cdiv(rows, tr)

    # Pure metadata reshape (contiguous) — no HBM copy.
    x3 = x.reshape(B, rows, _LANE)

    data_bytes = x3.size * x3.dtype.itemsize
    cost = pl.CostEstimate(
        flops=3 * x3.size,                  # add + max + min per element
        transcendentals=0,
        bytes_accessed=2 * data_bytes + B * 4,
    )

    out3 = pl.pallas_call(
        _adjust_brightness_kernel,
        out_shape=jax.ShapeDtypeStruct((B, rows, _LANE), orig_dtype),
        grid_spec=pltpu.PrefetchScalarGridSpec(
            num_scalar_prefetch=1,
            grid=(B, row_tiles),
            in_specs=[pl.BlockSpec((1, tr, _LANE), lambda b, r, f_ref: (b, r, 0))],
            out_specs=pl.BlockSpec((1, tr, _LANE), lambda b, r, f_ref: (b, r, 0)),
        ),
        compiler_params=pltpu.CompilerParams(
            dimension_semantics=("parallel", "parallel"),
        ),
        cost_estimate=cost,
    )(factor, x3)

    return out3.reshape(orig_shape)


class AdjustBrightness:
    """JAX/Pallas counterpart of kornia.enhance.AdjustBrightness."""

    def __init__(self, brightness_factor):
        self.brightness_factor = brightness_factor

    def __call__(self, x):
        return adjust_brightness_pallas(x, self.brightness_factor)


if __name__ == "__main__":
    key = jax.random.PRNGKey(0)
    kx, kf = jax.random.split(key)

    B, C, H, W = 2, 4, 16, 16
    x = jax.random.uniform(kx, (B, C, H, W), dtype=jnp.float32)  # image in [0, 1]
    # Per-batch brightness factors; values outside [0,1] exercise the clamp.
    brightness = jax.random.uniform(kf, (B,), dtype=jnp.float32, minval=-0.5, maxval=0.5)

    # Per-batch tensor factor (Pallas path).
    out = AdjustBrightness(brightness)(x)
    out = jax.block_until_ready(out)
    ref = jnp.clip(x + brightness.reshape(B, 1, 1, 1), 0.0, 1.0)
    assert out.shape == x.shape and out.dtype == x.dtype
    assert jnp.max(jnp.abs(out - ref)) < 1e-6

    # Scalar (python float) factor path, as in the original kornia API.
    out_s = AdjustBrightness(0.25)(x)
    out_s = jax.block_until_ready(out_s)
    ref_s = jnp.clip(x + 0.25, 0.0, 1.0)
    assert jnp.max(jnp.abs(out_s - ref_s)) < 1e-6

    # Ragged inner size exercises the fused-XLA fallback path.
    xr = jax.random.uniform(kx, (2, 3, 5, 7), dtype=jnp.float32)
    out_r = AdjustBrightness(brightness)(xr)
    out_r = jax.block_until_ready(out_r)
    ref_r = jnp.clip(xr + brightness.reshape(2, 1, 1, 1), 0.0, 1.0)
    assert jnp.max(jnp.abs(out_r - ref_r)) < 1e-6

    print("KERNEL_OK")
</pallas_src>

<mosaic_0001>
module attributes {stable_mosaic.version = 11 : i64} {
  func.func @_adjust_brightness_kernel(%arg0: i32, %arg1: i32, %arg2: memref<2xf32, #tpu.memory_space<smem>>, %arg3: memref<1x8x128xf32, #tpu.memory_space<vmem>>, %arg4: memref<1x8x128xf32, #tpu.memory_space<vmem>>) attributes {dimension_semantics = [#tpu.dimension_semantics<parallel>, #tpu.dimension_semantics<parallel>], iteration_bounds = array<i64: 2, 1>, scalar_prefetch = 1 : i64, scratch_operands = 0 : i64, tpu.core_type = #tpu.core_type<tc>, window_params = [{transform_indices = @transform_0, window_bounds = array<i64: 1, 8, 128>}, {transform_indices = @transform_1, window_bounds = array<i64: 1, 8, 128>}]} {
    %0 = arith.index_cast %arg0 : i32 to index
    %1 = memref.load %arg2[%0] : memref<2xf32, #tpu.memory_space<smem>>
    %c0 = arith.constant 0 : index
    %c0_0 = arith.constant 0 : index
    %c0_1 = arith.constant 0 : index
    %2 = vector.load %arg3[%c0, %c0_0, %c0_1] : memref<1x8x128xf32, #tpu.memory_space<vmem>>, vector<1x8x128xf32>
    %3 = vector.broadcast %1 : f32 to vector<1x8x128xf32>
    %4 = arith.addf %2, %3 : vector<1x8x128xf32>
    %cst = arith.constant 0.000000e+00 : f32
    %cst_2 = arith.constant 1.000000e+00 : f32
    %5 = vector.broadcast %cst : f32 to vector<1x8x128xf32>
    %6 = arith.maximumf %5, %4 : vector<1x8x128xf32>
    %7 = vector.broadcast %cst_2 : f32 to vector<1x8x128xf32>
    %8 = arith.minimumf %7, %6 : vector<1x8x128xf32>
    %c0_3 = arith.constant 0 : index
    %c0_4 = arith.constant 0 : index
    %c0_5 = arith.constant 0 : index
    %9 = vector.load %arg4[%c0_3, %c0_4, %c0_5] : memref<1x8x128xf32, #tpu.memory_space<vmem>>, vector<1x8x128xf32>
    tpu.vector_store %arg4[%c0_3, %c0_4, %c0_5], %8 {strides = array<i32>} : memref<1x8x128xf32, #tpu.memory_space<vmem>>, vector<1x8x128xf32>,
    return
  }
  func.func @transform_0(%arg0: i32, %arg1: i32, %arg2: memref<2xf32, #tpu.memory_space<smem>>) -> (i32, i32, i32) {
    %c0_i32 = arith.constant 0 : i32
    %c0_i32_0 = arith.constant 0 : i32
    return %arg0, %arg1, %c0_i32 : i32, i32, i32
  }
  func.func @transform_1(%arg0: i32, %arg1: i32, %arg2: memref<2xf32, #tpu.memory_space<smem>>) -> (i32, i32, i32) {
    %c0_i32 = arith.constant 0 : i32
    %c0_i32_0 = arith.constant 0 : i32
    return %arg0, %arg1, %c0_i32 : i32, i32, i32
  }
}

</mosaic_0001>

<bundles_post_ra>
// kernel: tpu_custom_call.1
= control target key start
LH: loop header
LB: loop body
LE: loop exit
PB: predicated region body
PF: predicated region fallthrough
CT: control target
= control target key end

     0   :  { %s661_s0 = inlined_call_operand.hbm [shape: f32[2], index: 0, kind: input, shape index: {}]   ;;  %s662_s1 = inlined_call_operand.hbm [shape: f32[2,8,128], index: 1, kind: input, shape index: {}]   ;;  %s663_s2 = inlined_call_operand.hbm [shape: f32[2,8,128], index: 2, kind: output, shape index: {}]  }
   0x1   :  { %s332_s11 = scalar_lea.hbm %s661_s0, 16 }
   0x2   :  { %p333_p0 = scmp.ne.s32.totalorder %s661_s0, %s332_s11  ;;  %p336_p1 = scmp.lt.u32.totalorder %s332_s11, %s661_s0 }
   0x4   :  { %p338_p2 = pnand %p336_p1, %p333_p0 }
   0x6   :  { %341 = shalt.err (!%p338_p2)  }
   0x7   :  { %s458_s16 = smov [#allocation3]  }
   0x8   :  { %8 = dma.hbm_to_smem %s661_s0, 16, %s458_s16, [#allocation2] }
   0x9   :  { %424 = dma.done.wait [#allocation2], 16 }
   0xa   :  { %425 = vsyncadd [#allocation2], 4294967280 }
   0xb   :  { %10 = sfence }
   0xc   :  { %11 = vsyncpa [#allocation5], 0 }
   0xd   :  { %13 = vsyncpa [#allocation5 + $0x1], 0 }
   0xe   :  { %14 = vsyncpa [#allocation6], 0 }
   0xf   :  { %16 = vsyncpa [#allocation6 + $0x1], 0  ;;  %s488_s19 = smov 0   ;;  %s490_s20 = smov 0  }
  0x10   :  { %s492_s21 = smov 0   ;;  %s494_s22 = smov 0  }
  0x11   :  { %s496_s23 = smov 0   ;;  %s498_s24 = smov 0  }
  0x12 LB: > { %s256_s0 = sadd.s32 4294967295, %s456_s24   ;;  %s257_s25 = sadd.s32 4294967294, %s456_s24   ;;  %s456_s24 = sphi %s498_s24, %s22_s24   ;;  %s452_s23 = sphi %s496_s23, %s679_s23   ;;  %s448_s22 = sphi %s494_s22, %s678_s22   ;;  %s444_s21 = sphi %s492_s21, %s677_s21   ;;  %s440_s20 = sphi %s490_s20, %s676_s20   ;;  %s436_s19 = sphi %s488_s19, %s675_s19  }
  0x13   : > { %s34_s26 = sadd.s32 1, %s452_s23  ;;  %s43_s27 = sadd.s32 1, %s444_s21 }
  0x14   : > { %p36_p3 = scmp.ge.s32.totalorder %s34_s26, 2  ;;  %p50_p4 = scmp.ne.s32.totalorder %s444_s21, %s440_s20 }
  0x15   : > { %p51_p5 = scmp.eq.s32.totalorder %s456_s24, 0  ;;  %p56_p6 = scmp.ne.s32.totalorder %s440_s20, %s436_s19 }
  0x16   : > { %s681_s26 = smov (%p36_p3, %s34_s26), 0  ;;  %p57_p8 = scmp.eq.s32.totalorder %s256_s0, 0 }
  0x17   : > { %p529_p7 = por %p51_p5, %p50_p4  ;;  %s38_s29 = ssub.s32 %s452_s23, %s681_s26 }
  0x18   : > { %p82_p9 = scmp.eq.s32.totalorder %s256_s0, 1  ;;  %p41_p10 = scmp.eq.s32.totalorder %s38_s29, 0 }
  0x19   : > { %p535_p11 = por %p57_p8, %p56_p6  ;;  %p88_p13 = scmp.eq.s32.totalorder %s257_s25, 1 }
  0x1a   : > { %p539_p12 = por %p82_p9, %p50_p4  ;;  %p281_p2 = scmp.lt.s32.totalorder %s456_s24, 2 }
  0x1b   : > { %s544_s4 = scalar_select %p41_p10, %s444_s21, %s43_s27  }
  0x1c   : > { %s667_s3 = scalar_select %p539_p12, 1, 0 }
  0x1d   : > { %p546_p0 = por %p88_p13, %p56_p6  ;;  %s108_s6 = sand.u32 1, %s444_s21  }
  0x1e   : > { %s260_s7 = sshll.u32 %s108_s6, 3  ;;  %s261_s8 = sshll.u32 %s452_s23, 7 }
  0x1f   : > { %s668_s5 = scalar_select %p546_p0, 1, 0 }
  0x20   : > { %s557_s11 = scalar_lea.hbm %s662_s1, %s261_s8  ;;  %s112_s12 = scalar_lea.vmem [#allocation4], %s260_s7 }
  0x21   : > { %s120_s13 = sshll.u32 %s112_s12, 4  ;;  %p563_p3 = pnand %p281_p2, %p529_p7  ;;  %s559_s13 = int_to_ptr.vmem [resolvable:$true] %s120_s13 }
  0x22   : > { %s109_s15 = scalar_lea.sflag [#allocation5], %s108_s6  ;;  %s342_s16 = scalar_lea.hbm %s557_s11, 128 }
  0x23   : > { %p343_p6 = scmp.ne.s32.totalorder %s557_s11, %s342_s16  ;;  %p344_p8 = pneg %p563_p3 }
  0x24   : > { %s347_s0 = scalar_lea.hbm %s662_s1, 256  ;;  %p348_p7 = scmp.lt.u32.totalorder %s557_s11, %s662_s1 }
  0x25   : > { %p345_p9 = pnand %p344_p8, %p343_p6  ;;  %p349_p13 = scmp.lt.u32.totalorder %s347_s0, %s342_s16 }
  0x26   : > { %p351_p1 = scmp.lt.u32.totalorder %s342_s16, %s557_s11 }
  0x27   : > { %p346_p10 = pneg %p345_p9  ;;  %p350_p2 = por %p349_p13, %p348_p7 }
  0x29   : > { %p352_p4 = por %p351_p1, %p350_p2 }
  0x2b   : > { %p353_p5 = pnand %p352_p4, %p346_p10 }
  0x2d   : > { %356 = shalt.err (!%p353_p5)
}
  0x2e   : > { %s357_s28 = scalar_lea.vmem %s559_s13, 128  ;;  %s459_s29 = smov [#allocation4]  }
  0x2f   : > { %p358_p6 = scmp.ne.s32.totalorder %s559_s13, %s357_s28  ;;  %s362_s6 = sshll.u32 %s459_s29, 4  ;;  %s363_s6 = int_to_ptr.vmem [resolvable:$false] %s362_s6 }
  0x30   : > { %s364_s7 = scalar_lea.vmem %s363_s6, 256  ;;  %p365_p12 = scmp.lt.s32.totalorder %s559_s13, %s363_s6 }
  0x31   : > { %p360_p9 = pnand %p358_p6, %p344_p8  ;;  %p366_p7 = scmp.lt.s32.totalorder %s364_s7, %s357_s28 }
  0x33   : > { %p361_p0 = pneg %p360_p9  ;;  %p367_p13 = por %p366_p7, %p365_p12 }
  0x35   : > { %p368_p1 = pnand %p367_p13, %p361_p0 }
  0x37   : > { %371 = shalt.err (!%p368_p1)
}
  0x38   : > { %276 = dma.hbm_to_vmem [thread:$0]  (!%p563_p3), %s557_s11, 128, %s559_s13, %s109_s15  }
  0x39   : > { %p670_p4 = scmp.lt.s32.totalorder %s456_s24, 3  ;;  %p671_p5 = scmp.ge.s32.totalorder %s456_s24, 1 }
  0x3b   : > { %p126_p8 = pnand %p671_p5, %p670_p4 }
  0x3c   : > { %s599_s8 = sand.u32 (!%p126_p8), 1, %s440_s20  }
  0x3d   : > { %129 = sbr.rel (%p126_p8) target bundleno = 96 (0x60), region = 24  ;;  %s263_s9 = sshll.u32 (!%p126_p8), %s599_s8, 3 }
  0x3e   : > { %s132_s10 = scalar_lea.sflag (!%p126_p8), [#allocation5], %s599_s8  ;;  %s135_s12 = scalar_lea.vmem (!%p126_p8), [#allocation4], %s263_s9 }
  0x44   : > { %427 = dma.done.wait (%p535_p11), %s132_s10, 128  }
  0x45   : > { %429 = vsyncadd (%p535_p11), %s132_s10, 4294967168  ;;  %s154_s11 = sld [smem:[#allocation3 + %s448_s22]]  ;;  %v155_v1 = vld [vmem:[%s135_s12] sm:$0xff]  ;;  %s153_s13 = scalar_lea.vmem [#allocation7], %s263_s9 }
  0x46   : > { %s176_s14 = sshll.u32 %s153_s13, 4  ;;  %s266_s15 = sshll.u32 %s448_s22, 7  ;;  %s609_s14 = int_to_ptr.vmem [resolvable:$true] %s176_s14 }
  0x47   : > { %s614_s30 = scalar_lea.hbm %s663_s2, %s266_s15  ;;  %s162_s18 = scalar_lea.sflag [#allocation6], %s599_s8 }
  0x48   : > { %s372_s0 = scalar_lea.vmem %s609_s14, 128  ;;  %p672_p12 = scmp.ne.s32.totalorder %s667_s3, 0 }
  0x49   : > { %p373_p11 = scmp.ne.s32.totalorder %s609_s14, %s372_s0  ;;  %s460_s22 = smov [#allocation7]  }
  0x4a   : > { %s376_s25 = sshll.u32 %s460_s22, 4  ;;  %s377_s25 = int_to_ptr.vmem [resolvable:$false] %s376_s25 }
  0x4b   : > { %v156_v0 = vstv %s154_s11  ;;  %p374_p0 = pnand %p373_p11, %p672_p12  ;;  %s378_s27 = scalar_lea.vmem %s377_s25, 256 }
  0x4c   : > { %v157_v2 = vadd.f32 %v156_v0, %v155_v1  ;;  %p379_p10 = scmp.lt.s32.totalorder %s609_s14, %s377_s25  ;;  %p380_p2 = scmp.lt.s32.totalorder %s378_s27, %s372_s0 }
  0x4d   : > { %p375_p3 = pneg %p374_p0 }
  0x4e   : > { %v158_v3 = vmax.f32 %v157_v2, 0.0  ;;  %p381_p6 = por %p380_p2, %p379_p10 }
  0x50   : > { %v159_v4 = vmin.f32 %v158_v3, 1.0  ;;  %p382_p9 = pnand %p381_p6, %p375_p3 }
  0x52   : > { %160 = vst [vmem:[%s153_s13] sm:$0xff] %v159_v4 }
  0x53   : > { %385 = shalt.err (!%p382_p9)
}
  0x54   : > { %s386_s28 = scalar_lea.hbm %s614_s30, 128  ;;  %s390_s7 = scalar_lea.hbm %s663_s2, 256 }
  0x55   : > { %p387_p7 = scmp.ne.s32.totalorder %s614_s30, %s386_s28  ;;  %p391_p4 = scmp.lt.u32.totalorder %s614_s30, %s663_s2 }
  0x56   : > { %p392_p5 = scmp.lt.u32.totalorder %s390_s7, %s386_s28  ;;  %p394_p11 = scmp.lt.u32.totalorder %s386_s28, %s614_s30 }
  0x57   : > { %p388_p13 = pnand %p387_p7, %p672_p12 }
  0x58   : > { %p393_p8 = por %p392_p5, %p391_p4 }
  0x59   : > { %p389_p1 = pneg %p388_p13 }
  0x5a   : > { %p395_p0 = por %p394_p11, %p393_p8 }
  0x5c   : > { %p396_p3 = pnand %p395_p0, %p389_p1 }
  0x5e   : > { %399 = shalt.err (!%p396_p3)
}
  0x5f   : > { %271 = dma.vmem_to_hbm [thread:$0]  (%p672_p12), %s609_s14, 128, %s614_s30, %s162_s18  }
  0x60 PF: > { %s188_s10 = sand.u32 1, %s436_s19   ;;  %p673_p10 = scmp.ne.s32.totalorder %s668_s5, 0 }
  0x61   : > { %p674_p2 = scmp.ge.s32.totalorder %s456_s24, 2  ;;  %s189_s12 = scalar_lea.sflag [#allocation6], %s188_s10 }
  0x63   : > { %p278_p6 = pnand %p674_p2, %p673_p10 }
  0x65   : > { %431 = dma.done.wait (!%p278_p6), %s189_s12, 128  }
  0x66   : > { %433 = vsyncadd (!%p278_p6), %s189_s12, 4294967168  ;;  %s22_s24 = sadd.s32 1, %s456_s24   ;;  %s675_s19 = smov %s440_s20 }
  0x67   : > { %p19_p9 = scmp.ge.s32.totalorder %s22_s24, 4   ;;  %s676_s20 = smov %s444_s21 }
  0x68   : > { %s677_s21 = smov %s544_s4  ;;  %s678_s22 = smov %s452_s23 }
  0x69   : > { %s679_s23 = smov %s681_s26  ;;  %21 = sbr.rel (!%p19_p9) target bundleno = 18 (0x12), region = 69 }
  0x70   :  { %194 = vsyncpa [#allocation5], 1 }
  0x71   :  { %196 = vsyncpa [#allocation5 + $0x1], 1 }
  0x72   :  { %197 = vsyncpa [#allocation6], 1 }
  0x73   :  { %199 = vsyncpa [#allocation6 + $0x1], 1 }

</bundles_post_ra>
